<compile_context>
chip_gen: v7x
topology: tpu7x:2x2x1
jax: 0.10.0
libtpu: 0.0.40
codegen_flags: <defaults>
</compile_context>

<pallas_src>
import jax
import jax.numpy as jnp
from jax.experimental import pallas as pl
from jax.experimental.pallas import tpu as pltpu

# ---- small, module-consistent shapes -------------------------------------
B = 2                     # batch
L = 32                    # max_length (fixed to 32 in the module)
H = 32                    # stand-in hidden_size (bert.config.hidden_size)
C = 100                   # Conv1d out_channels
C_PAD = 128               # out_channels padded to a full lane width
KS = (2, 3, 4)            # kernel sizes
MAXK = 4                  # largest kernel size -> shared im2col depth
KDIM = MAXK * H           # 128: fused matmul K (all branches share it)
NCOL = len(KS) * C_PAD    # 384: fused matmul N (3 branches packed along lanes)
NFEAT = 2 * len(KS) * C   # 600 (each conv branch is applied twice)
EPS = 1e-5
VOCAB = 1000
NEG = -1e30               # additive "invalid position" mask value


def cnn_head_kernel(xk_ref, w_ref, mask_ref, bconv_ref, weff_ref, misc_ref,
                    out_ref):
    """xk_ref  : [B*L, KDIM]  bf16  host-built im2col of the encoder output
       w_ref   : [KDIM, NCOL] bf16  3 conv weights, K-padded + packed along N
       mask_ref: [L, NCOL]    f32   additive validity mask (0 valid / -1e30)
       bconv_ref:[1, NCOL]    f32   conv biases (zero in padded channels)
       weff_ref: [1, NCOL]    f32   folded Linear(600->1) weights (zero pad)
       misc_ref (SMEM): [5] = [linear_bias, bn_gamma, bn_beta, bn_mean, bn_var]
       out_ref : [B, 1]       f32"""
    # One fused MXU matmul for all three conv branches; f32 accumulation.
    conv = jnp.dot(xk_ref[...], w_ref[...],
                   preferred_element_type=jnp.float32)          # [B*L, NCOL]
    # MaxPool over valid time positions of each branch (single masked max).
    conv = conv.reshape(B, L, NCOL) + mask_ref[...]             # bcast over B
    p = jnp.max(conv, axis=1)                                   # [B, NCOL]
    # Conv bias + ReLU folded after the max (monotone ReLU, position-free bias).
    p = jnp.maximum(p + bconv_ref[...], 0.0)
    # Linear(600->1): one cross-lane reduction (branch duplicates pre-summed).
    z = jnp.sum(p * weff_ref[...], axis=-1, keepdims=True)      # [B, 1]
    b_lin = misc_ref[0]
    gamma = misc_ref[1]
    beta = misc_ref[2]
    mean = misc_ref[3]
    var = misc_ref[4]
    # dropout1 (p=0.5): identity in eval mode
    z = z + b_lin                                                # Linear bias
    z = (z - mean) * jax.lax.rsqrt(var + EPS) * gamma + beta     # BatchNorm1d (eval)
    # Exact, numerically stable sigmoid (output is only [B, 1]).
    out_ref[...] = jnp.where(z >= 0.0,
                             1.0 / (1.0 + jnp.exp(-z)),
                             jnp.exp(z) / (1.0 + jnp.exp(z)))


@jax.jit
def cnn_head(xk, w_packed, mask_add, bconv, weff, misc):
    return pl.pallas_call(
        cnn_head_kernel,
        out_shape=jax.ShapeDtypeStruct((B, 1), jnp.float32),
        in_specs=[pl.BlockSpec(memory_space=pltpu.MemorySpace.VMEM)] * 5
                 + [pl.BlockSpec(memory_space=pltpu.MemorySpace.SMEM)],
        out_specs=pl.BlockSpec(memory_space=pltpu.MemorySpace.VMEM),
    )(xk, w_packed, mask_add, bconv, weff, misc)


def init_params(key):
    ks = jax.random.split(key, 8)
    emb = jax.random.normal(ks[0], (VOCAB, H), jnp.float32) * 0.05

    # PyTorch Conv1d weight is [C_out, H, k]; stored here in im2col layout
    # [k*H, C] with w[dk*H + h, c] == w_torch[c, h, dk], then K-padded to KDIM
    # (zero rows for dk >= k) and N-padded to C_PAD, packed along N per branch.
    cols = []
    for ki, k in enumerate(KS):
        w = jax.random.normal(ks[1 + ki], (k * H, C), jnp.float32) * 0.05
        w = jnp.pad(w, ((0, KDIM - k * H), (0, C_PAD - C)))        # [128, 128]
        cols.append(w)
    w_packed = jnp.concatenate(cols, axis=1).astype(jnp.bfloat16)  # [128, 384]

    # Conv biases (zero in padded channels), flattened to the packed N layout.
    bconv = jax.random.normal(ks[4], (len(KS), C), jnp.float32) * 0.05
    bconv = jnp.pad(bconv, ((0, 0), (0, C_PAD - C))).reshape(1, NCOL)

    # Linear(600->1): feature layout is [p2, p2, p3, p3, p4, p4] (each branch
    # applied twice, adjacent) — fold the two identical copies per branch.
    wlin = jax.random.normal(ks[5], (NFEAT,), jnp.float32) * 0.05
    weff = wlin.reshape(len(KS), 2, C).sum(axis=1)                 # [3, 100]
    weff = jnp.pad(weff, ((0, 0), (0, C_PAD - C))).reshape(1, NCOL)

    # Additive validity mask: position t is valid for branch ki iff t < L-k+1.
    t = jnp.arange(L)[:, None]                                     # [L, 1]
    lout = jnp.array([L - k + 1 for k in KS], jnp.int32)[None, :]  # [1, 3]
    mask_add = jnp.where(t < lout, 0.0, NEG).astype(jnp.float32)   # [L, 3]
    mask_add = jnp.repeat(mask_add, C_PAD, axis=1)                 # [L, NCOL]

    b_lin = jax.random.normal(ks[6], (), jnp.float32) * 0.05
    gamma = jnp.float32(1.0)   # BatchNorm1d default affine params
    beta = jnp.float32(0.0)
    mean = jnp.float32(0.0)    # running stats (eval mode)
    var = jnp.float32(1.0)
    misc = jnp.stack([b_lin, gamma, beta, mean, var]).astype(jnp.float32)
    return emb, w_packed, mask_add, bconv, weff, misc


def forward(input_ids, params):
    emb, w_packed, mask_add, bconv, weff, misc = params
    # bert stand-in (glue): outputs[0] ~ embedding lookup, shape [B, L, H]
    x = emb[input_ids]
    # Host-side im2col: per-batch shifted copies, zero-padded at the tail so
    # shifted windows never read across batch boundaries.  [B, L, MAXK*H]
    xs = [jnp.pad(x[:, dk:, :], ((0, 0), (0, dk), (0, 0))) for dk in range(MAXK)]
    xk = jnp.concatenate(xs, axis=-1).reshape(B * L, KDIM).astype(jnp.bfloat16)
    return cnn_head(xk, w_packed, mask_add, bconv, weff, misc)


if __name__ == "__main__":
    key = jax.random.PRNGKey(0)
    pkey, dkey = jax.random.split(key)
    params = init_params(pkey)
    input_ids = jax.random.randint(dkey, (B, L), 0, VOCAB, dtype=jnp.int32)
    out = forward(input_ids, params)
    jax.block_until_ready(out)
    assert out.shape == (B, 1)
    print("KERNEL_OK")
</pallas_src>

<mosaic_0001>
module attributes {stable_mosaic.version = 11 : i64} {
  func.func @cnn_head_kernel(%arg0: memref<64x128xbf16, #tpu.memory_space<vmem>>, %arg1: memref<128x384xbf16, #tpu.memory_space<vmem>>, %arg2: memref<32x384xf32, #tpu.memory_space<vmem>>, %arg3: memref<1x384xf32, #tpu.memory_space<vmem>>, %arg4: memref<1x384xf32, #tpu.memory_space<vmem>>, %arg5: memref<5xf32, #tpu.memory_space<smem>>, %arg6: memref<2x1xf32, #tpu.memory_space<vmem>>) attributes {dimension_semantics = [], scalar_prefetch = 0 : i64, scratch_operands = 0 : i64, tpu.core_type = #tpu.core_type<tc>} {
    %c0 = arith.constant 0 : index
    %c0_0 = arith.constant 0 : index
    %0 = vector.load %arg0[%c0, %c0_0] : memref<64x128xbf16, #tpu.memory_space<vmem>>, vector<64x128xbf16>
    %c0_1 = arith.constant 0 : index
    %c0_2 = arith.constant 0 : index
    %1 = vector.load %arg1[%c0_1, %c0_2] : memref<128x384xbf16, #tpu.memory_space<vmem>>, vector<128x384xbf16>
    %cst = arith.constant dense<0.000000e+00> : vector<64x384xf32>
    %2 = tpu.matmul %0, %1, %cst {dimension_numbers = #tpu.dot_dimension_numbers<[1], [0], [0], [1], [0, 0, 1, 1], [], []>} : vector<64x128xbf16>, vector<128x384xbf16>, vector<64x384xf32> -> vector<64x384xf32>
    %3 = vector.shape_cast %2 : vector<64x384xf32> to vector<2x32x384xf32>
    %c0_3 = arith.constant 0 : index
    %c0_4 = arith.constant 0 : index
    %4 = vector.load %arg2[%c0_3, %c0_4] : memref<32x384xf32, #tpu.memory_space<vmem>>, vector<32x384xf32>
    %5 = vector.shape_cast %4 : vector<32x384xf32> to vector<1x32x384xf32>
    %6 = vector.broadcast %5 : vector<1x32x384xf32> to vector<2x32x384xf32>
    %7 = arith.addf %3, %6 : vector<2x32x384xf32>
    %cst_5 = arith.constant dense<0xFF800000> : vector<2x384xf32>
    %8 = vector.multi_reduction <maximumf>, %7, %cst_5 [1] : vector<2x32x384xf32> to vector<2x384xf32>
    %c0_6 = arith.constant 0 : index
    %c0_7 = arith.constant 0 : index
    %9 = vector.load %arg3[%c0_6, %c0_7] : memref<1x384xf32, #tpu.memory_space<vmem>>, vector<1x384xf32>
    %10 = vector.broadcast %9 : vector<1x384xf32> to vector<2x384xf32>
    %11 = arith.addf %8, %10 : vector<2x384xf32>
    %cst_8 = arith.constant 0.000000e+00 : f32
    %12 = vector.broadcast %cst_8 : f32 to vector<2x384xf32>
    %13 = arith.maximumf %11, %12 : vector<2x384xf32>
    %c0_9 = arith.constant 0 : index
    %c0_10 = arith.constant 0 : index
    %14 = vector.load %arg4[%c0_9, %c0_10] : memref<1x384xf32, #tpu.memory_space<vmem>>, vector<1x384xf32>
    %15 = vector.broadcast %14 : vector<1x384xf32> to vector<2x384xf32>
    %16 = arith.mulf %13, %15 : vector<2x384xf32>
    %cst_11 = arith.constant dense<0.000000e+00> : vector<2xf32>
    %17 = vector.multi_reduction <add>, %16, %cst_11 [1] : vector<2x384xf32> to vector<2xf32>
    %18 = vector.shape_cast %17 : vector<2xf32> to vector<2x1xf32>
    %c0_12 = arith.constant 0 : index
    %19 = memref.load %arg5[%c0_12] : memref<5xf32, #tpu.memory_space<smem>>
    %c1 = arith.constant 1 : index
    %20 = memref.load %arg5[%c1] : memref<5xf32, #tpu.memory_space<smem>>
    %c2 = arith.constant 2 : index
    %21 = memref.load %arg5[%c2] : memref<5xf32, #tpu.memory_space<smem>>
    %c3 = arith.constant 3 : index
    %22 = memref.load %arg5[%c3] : memref<5xf32, #tpu.memory_space<smem>>
    %c4 = arith.constant 4 : index
    %23 = memref.load %arg5[%c4] : memref<5xf32, #tpu.memory_space<smem>>
    %24 = vector.broadcast %19 : f32 to vector<2x1xf32>
    %25 = arith.addf %18, %24 : vector<2x1xf32>
    %26 = vector.broadcast %22 : f32 to vector<2x1xf32>
    %27 = arith.subf %25, %26 : vector<2x1xf32>
    %cst_13 = arith.constant 9.99999974E-6 : f32
    %28 = arith.addf %23, %cst_13 : f32
    %29 = math.rsqrt %28 : f32
    %30 = vector.broadcast %29 : f32 to vector<2x1xf32>
    %31 = arith.mulf %27, %30 : vector<2x1xf32>
    %32 = vector.broadcast %20 : f32 to vector<2x1xf32>
    %33 = arith.mulf %31, %32 : vector<2x1xf32>
    %34 = vector.broadcast %21 : f32 to vector<2x1xf32>
    %35 = arith.addf %33, %34 : vector<2x1xf32>
    %cst_14 = arith.constant 0.000000e+00 : f32
    %36 = vector.broadcast %cst_14 : f32 to vector<2x1xf32>
    %37 = arith.cmpf oge, %35, %36 : vector<2x1xf32>
    %cst_15 = arith.constant 0.000000e+00 : f32
    %38 = vector.broadcast %cst_15 : f32 to vector<2x1xf32>
    %39 = arith.subf %38, %35 : vector<2x1xf32>
    %40 = math.exp %39 : vector<2x1xf32>
    %cst_16 = arith.constant 1.000000e+00 : f32
    %41 = vector.broadcast %cst_16 : f32 to vector<2x1xf32>
    %42 = arith.addf %41, %40 : vector<2x1xf32>
    %cst_17 = arith.constant 1.000000e+00 : f32
    %43 = vector.broadcast %cst_17 : f32 to vector<2x1xf32>
    %44 = arith.divf %43, %42 : vector<2x1xf32>
    %45 = math.exp %35 : vector<2x1xf32>
    %46 = math.exp %35 : vector<2x1xf32>
    %cst_18 = arith.constant 1.000000e+00 : f32
    %47 = vector.broadcast %cst_18 : f32 to vector<2x1xf32>
    %48 = arith.addf %47, %46 : vector<2x1xf32>
    %49 = arith.divf %45, %48 : vector<2x1xf32>
    %50 = arith.select %37, %44, %49 : vector<2x1xi1>, vector<2x1xf32>
    %c0_19 = arith.constant 0 : index
    %c0_20 = arith.constant 0 : index
    %51 = vector.load %arg6[%c0_19, %c0_20] : memref<2x1xf32, #tpu.memory_space<vmem>>, vector<2x1xf32>
    tpu.vector_store %arg6[%c0_19, %c0_20], %50 {strides = array<i32>} : memref<2x1xf32, #tpu.memory_space<vmem>>, vector<2x1xf32>,
    return
  }
}

</mosaic_0001>

<bundles_post_ra>
// kernel: cnn_head.1
= control target key start
LH: loop header
LB: loop body
LE: loop exit
PB: predicated region body
PF: predicated region fallthrough
CT: control target
= control target key end

     0   :  { %11 = vsyncpa [#allocation3], 0  ;;  %s948_s0 = inlined_call_operand.hbm [shape: bf16[64,128], index: 0, kind: input, shape index: {}]   ;;  %s949_s1 = inlined_call_operand.hbm [shape: bf16[128,384], index: 1, kind: input, shape index: {}]   ;;  %s950_s2 = inlined_call_operand.hbm [shape: f32[32,384], index: 2, kind: input, shape index: {}]   ;;  %s951_s3 = inlined_call_operand.vmem [shape: f32[1,384], index: 3, kind: input, shape index: {}]   ;;  %s952_s4 = inlined_call_operand.vmem [shape: f32[1,384], index: 4, kind: input, shape index: {}]   ;;  %s953_s5 = inlined_call_operand.vmem [shape: f32[5], index: 5, kind: input, shape index: {}]   ;;  %s954_s6 = inlined_call_operand.vmem [shape: f32[2,1], index: 6, kind: output, shape index: {}]  }
   0x1   :  { %12 = vsyncpa [#allocation6], 0 }
   0x2   :  { %13 = vsyncpa [#allocation4], 0  ;;  %s826_s21 = smov [#allocation5]   ;;  %s742_s25 = scalar_lea.hbm %s949_s1, 3072 }
   0x3   :  { %s31_s22 = sshll.u32 %s826_s21, 4  ;;  %p743_p0 = scmp.ne.s32.totalorder %s949_s1, %s742_s25  ;;  %s32_s22 = int_to_ptr.vmem [resolvable:$true] %s31_s22 }
   0x4   :  { %p746_p1 = scmp.lt.u32.totalorder %s742_s25, %s949_s1 }
   0x6   :  { %p748_p2 = pnand %p746_p1, %p743_p0 }
   0x8   :  { %751 = shalt.err (!%p748_p2)
}
   0x9   :  { %s752_s30 = scalar_lea.vmem %s32_s22, 3072  ;;  %p757_p4 = scmp.lt.s32.totalorder %s32_s22, %s32_s22 }
   0xa   :  { %p753_p3 = scmp.ne.s32.totalorder %s32_s22, %s752_s30  ;;  %p758_p5 = scmp.lt.s32.totalorder %s752_s30, %s752_s30 }
   0xc   :  { %p759_p6 = por %p758_p5, %p757_p4 }
   0xe   :  { %p760_p7 = pnand %p759_p6, %p753_p3 }
  0x10   :  { %763 = shalt.err (!%p760_p7)
}
  0x11   :  { %s827_s7 = smov 192   ;;  %s828_s8 = smov 12  }
  0x12   :  { %37 = dma.hbm_to_vmem [thread:$0]  %s949_s1, 3072, %s32_s22, [#allocation6], %s827_s7, %s827_s7, %s828_s8  }
  0x13   :  { %s829_s11 = smov [#allocation2]   ;;  %s764_s15 = scalar_lea.hbm %s948_s0, 512 }
  0x14   :  { %s19_s12 = sshll.u32 %s829_s11, 4  ;;  %p765_p8 = scmp.ne.s32.totalorder %s948_s0, %s764_s15  ;;  %s20_s12 = int_to_ptr.vmem [resolvable:$true] %s19_s12 }
  0x15   :  { %p768_p9 = scmp.lt.u32.totalorder %s764_s15, %s948_s0 }
  0x17   :  { %p770_p10 = pnand %p768_p9, %p765_p8 }
  0x19   :  { %773 = shalt.err (!%p770_p10)
}
  0x1a   :  { %s774_s20 = scalar_lea.vmem %s20_s12, 512  ;;  %p779_p12 = scmp.lt.s32.totalorder %s20_s12, %s20_s12 }
  0x1b   :  { %p775_p11 = scmp.ne.s32.totalorder %s20_s12, %s774_s20  ;;  %p780_p13 = scmp.lt.s32.totalorder %s774_s20, %s774_s20 }
  0x1d   :  { %p781_p0 = por %p780_p13, %p779_p12 }
  0x1f   :  { %p782_p1 = pnand %p781_p0, %p775_p11 }
  0x21   :  { %785 = shalt.err (!%p782_p1)
}
  0x22   :  { %s830_s1 = smov 64   ;;  %s831_s21 = smov 4  }
  0x23   :  { %25 = dma.hbm_to_vmem [thread:$0]  %s948_s0, 512, %s20_s12, [#allocation3], %s830_s1, %s830_s1, %s831_s21  }
  0x24   :  { %s832_s24 = smov [#allocation7]   ;;  %s60_s28 = sshll.u32 %s953_s5, 4  ;;  %s61_s28 = int_to_ptr.vmem [resolvable:$true] %s60_s28 }
  0x25   :  { %s43_s25 = sshll.u32 %s832_s24, 4  ;;  %s786_s7 = scalar_lea.hbm %s950_s2, 1536  ;;  %s44_s25 = int_to_ptr.vmem [resolvable:$true] %s43_s25 }
  0x26   :  { %p787_p2 = scmp.ne.s32.totalorder %s950_s2, %s786_s7  ;;  %p790_p3 = scmp.lt.u32.totalorder %s786_s7, %s950_s2 }
  0x28   :  { %p792_p4 = pnand %p790_p3, %p787_p2 }
  0x2a   :  { %795 = shalt.err (!%p792_p4)
}
  0x2b   :  { %s796_s0 = scalar_lea.vmem %s44_s25, 1536  ;;  %p801_p6 = scmp.lt.s32.totalorder %s44_s25, %s44_s25 }
  0x2c   :  { %p797_p5 = scmp.ne.s32.totalorder %s44_s25, %s796_s0  ;;  %p802_p7 = scmp.lt.s32.totalorder %s796_s0, %s796_s0 }
  0x2e   :  { %p803_p8 = por %p802_p7, %p801_p6 }
  0x30   :  { %p804_p9 = pnand %p803_p8, %p797_p5 }
  0x32   :  { %807 = shalt.err (!%p804_p9)
}
  0x33   :  { %s833_s5 = smov 384   ;;  %s834_s12 = smov 24  }
  0x34   :  { %49 = dma.hbm_to_vmem [thread:$0]  %s950_s2, 1536, %s44_s25, [#allocation6], %s833_s5, %s833_s5, %s834_s12  }
  0x35   :  { %s808_s15 = scalar_lea.vmem %s61_s28, 16  ;;  %p813_p11 = scmp.lt.s32.totalorder %s61_s28, %s61_s28 }
  0x36   :  { %p809_p10 = scmp.ne.s32.totalorder %s61_s28, %s808_s15  ;;  %p814_p12 = scmp.lt.s32.totalorder %s808_s15, %s808_s15 }
  0x38   :  { %p815_p13 = por %p814_p12, %p813_p11 }
  0x3a   :  { %p816_p0 = pnand %p815_p13, %p809_p10 }
  0x3c   :  { %819 = shalt.err (!%p816_p0)
}
  0x3d   :  { %s835_s16 = smov [#allocation8]  }
  0x3e   :  { %63 = dma.vmem_to_smem %s61_s28, 16, %s835_s16, [#allocation4]  }
  0x3f   :  { %820 = dma.done.wait [#allocation3], 512  }
  0x40   :  { %821 = vsyncadd [#allocation3], 4294966784 }
  0x41   :  { %822 = dma.done.wait [#allocation6], 4608  }
  0x42   :  { %823 = vsyncadd [#allocation6], 4294962688 }
  0x43   :  { %824 = dma.done.wait [#allocation4], 16  }
  0x44   :  { %825 = vsyncadd [#allocation4], 4294967280 }
  0x45   :  { %76 = sfence }
  0x46   :  { %v696_v0 = vld [vmem:[#allocation5 + $0x4] ss:$12 sps:$4 sm:$0xff]   ;;  %v698_v1 = vld [vmem:[#allocation5 + $0x8] ss:$12 sps:$4 sm:$0xff]   ;;  %v836_v2 = vmov 0   ;;  %v731_v28 = vld [vmem:[#allocation2 + $0x18] sm:$0xff]  }
  0x47   :  { %302 = vmatprep.mubr.bf16.mxu0 %v836_v2  ;;  %270 = vmatprep.subr.bf16.mxu0 %v696_v0  ;;  %v699_v3 = vld [vmem:[#allocation5] ss:$12 sps:$4 sm:$0xff]   ;;  %v700_v4 = vld [vmem:[#allocation5 + $0x1c] ss:$12 sps:$4 sm:$0xff]   ;;  %v703_v6 = vld [vmem:[#allocation5 + $0x18] ss:$12 sps:$4 sm:$0xff]  }
  0x48   :  { %659 = vmatprep.subr.bf16.mxu1 %v698_v1  ;;  %271 = vmatpush1.bf16.msra.mxu0 %v699_v3  ;;  %v702_v5 = vld [vmem:[#allocation5 + $0x20] ss:$12 sps:$4 sm:$0xff]   ;;  %v706_v8 = vld [vmem:[#allocation5 + $0x38] ss:$12 sps:$4 sm:$0xff]   ;;  %v707_v9 = vld [vmem:[#allocation5 + $0x30] ss:$12 sps:$4 sm:$0xff]  }
  0x49   :  { %660 = vmatpush3.bf16.msra.mxu1 %v698_v1  ;;  %272 = vmatprep.subr.bf16.mxu0 %v700_v4  ;;  %v704_v7 = vld [vmem:[#allocation5 + $0x34] ss:$12 sps:$4 sm:$0xff]   ;;  %v708_v10 = vld [vmem:[#allocation5 + $0x4c] ss:$12 sps:$4 sm:$0xff]   ;;  %v710_v11 = vld [vmem:[#allocation5 + $0x50] ss:$12 sps:$4 sm:$0xff]  }
  0x4a   :  { %661 = vmatprep.subr.bf16.mxu1 %v702_v5  ;;  %v711_v12 = vld [vmem:[#allocation5 + $0x48] ss:$12 sps:$4 sm:$0xff]   ;;  %v712_v13 = vld [vmem:[#allocation5 + $0x64] ss:$12 sps:$4 sm:$0xff]   ;;  %v715_v15 = vld [vmem:[#allocation5 + $0x60] ss:$12 sps:$4 sm:$0xff]  }
  0x4b   :  { %v714_v14 = vld [vmem:[#allocation5 + $0x68] ss:$12 sps:$4 sm:$0xff]   ;;  %v718_v17 = vld [vmem:[#allocation5 + $0x80] ss:$12 sps:$4 sm:$0xff]   ;;  %v719_v18 = vld [vmem:[#allocation5 + $0x78] ss:$12 sps:$4 sm:$0xff]  }
  0x4c   :  { %273 = vmatpush1.bf16.msra.mxu0 %v703_v6  ;;  %v716_v16 = vld [vmem:[#allocation5 + $0x7c] ss:$12 sps:$4 sm:$0xff]   ;;  %v728_v19 = vld [vmem:[#allocation2] sm:$0xff]   ;;  %v724_v23 = vld [vmem:[#allocation5 + $0xac] ss:$12 sps:$4 sm:$0xff]   ;;  %s646_s2 = sld [smem:[#allocation8 + $0x4]] }
  0x4d   :  { %662 = vmatpush3.bf16.msra.mxu1 %v702_v5  ;;  %274 = vmatprep.subr.bf16.mxu0 %v704_v7  ;;  %v720_v20 = vld [vmem:[#allocation5 + $0x94] ss:$12 sps:$4 sm:$0xff]   ;;  %v722_v21 = vld [vmem:[#allocation5 + $0x98] ss:$12 sps:$4 sm:$0xff]   ;;  %v723_v22 = vld [vmem:[#allocation5 + $0x90] ss:$12 sps:$4 sm:$0xff]  }
  0x4e   :  { %663 = vmatprep.subr.bf16.mxu1 %v706_v8  ;;  %675 = vmatprep.mubr.bf16.mxu1 %v728_v19  ;;  %v726_v24 = vld [vmem:[#allocation5 + $0xb0] ss:$12 sps:$4 sm:$0xff]   ;;  %v727_v25 = vld [vmem:[#allocation5 + $0xa8] ss:$12 sps:$4 sm:$0xff]   ;;  %v915_v33 = vld [vmem:[#allocation7] sm:$0xff]  ;;  %vm557_vm0 = vcmask 1041409  }
  0x4f   :  { %v729_v26 = vld [vmem:[#allocation2 + $0x8] sm:$0xff]   ;;  %v730_v27 = vld [vmem:[#allocation2 + $0x10] sm:$0xff]   ;;  %v919_v36 = vld [vmem:[#allocation7 + $0x18] sm:$0xff]  ;;  %vm566_vm1 = vcmask 1041408   ;;  %s645_s1 = sld [smem:[#allocation8 + $0x3]]  ;;  %s643_s21 = sld [smem:[#allocation8 + $0x1]] }
  0x50   :  { %275 = vmatpush1.bf16.msra.mxu0 %v707_v9  ;;  %v410_v31 = vld [vmem:[#allocation7 + $0x10] sm:$0xff]  ;;  %v917_v34 = vld [vmem:[#allocation7 + $0x8] sm:$0xff]  ;;  %v416_v38 = vld [vmem:[#allocation7 + $0x40] sm:$0xff]  ;;  %s644_s22 = sld [smem:[#allocation8 + $0x2]]  ;;  %vm606_vm2 = vcmask 1024  }
  0x51   :  { %664 = vmatpush3.bf16.msra.mxu1 %v706_v8  ;;  %276 = vmatprep.subr.bf16.mxu0 %v708_v10  ;;  %v921_v40 = vld [vmem:[#allocation7 + $0x20] sm:$0xff]  ;;  %v413_v41 = vld [vmem:[#allocation7 + $0x28] sm:$0xff]  ;;  %v419_v48 = vld [vmem:[#allocation7 + $0x58] sm:$0xff] }
  0x52   :  { %665 = vmatprep.subr.bf16.mxu1 %v710_v11  ;;  %s583_s17 = sadd.f32 1e-05, %s646_s2  ;;  %v414_v58 = vld [vmem:[#allocation7 + $0x30] sm:$0xff]  ;;  %v415_v59 = vld [vmem:[#allocation7 + $0x38] sm:$0xff]  ;;  %v417_v63 = vld [vmem:[#allocation7 + $0x48] sm:$0xff] }
  0x53   :  { %v418_v3 = vld [vmem:[#allocation7 + $0x50] sm:$0xff] }
  0x54   :  { %277 = vmatpush1.bf16.msra.mxu0 %v711_v12  ;;  %v584_v29 = vstv %s583_s17 }
  0x55   :  { %666 = vmatpush3.bf16.msra.mxu1 %v710_v11  ;;  %278 = vmatprep.subr.bf16.mxu0 %v712_v13  ;;  %732 = vrsqrt.f32 %v584_v29 }
  0x56   :  { %667 = vmatprep.subr.bf16.mxu1 %v714_v14 }
  0x58   :  { %279 = vmatpush1.bf16.msra.mxu0 %v715_v15 }
  0x59   :  { %668 = vmatpush3.bf16.msra.mxu1 %v714_v14  ;;  %280 = vmatprep.subr.bf16.mxu0 %v716_v16 }
  0x5a   :  { %669 = vmatprep.subr.bf16.mxu1 %v718_v17 }
  0x5c   :  { %281 = vmatpush1.bf16.msra.mxu0 %v719_v18 }
  0x5d   :  { %670 = vmatpush3.bf16.msra.mxu1 %v718_v17  ;;  %282 = vmatprep.subr.bf16.mxu0 %v720_v20 }
  0x5e   :  { %671 = vmatprep.subr.bf16.mxu1 %v722_v21 }
  0x5f   :  { %v733_v30 = vpop.eup %732 }
  0x60   :  { %283 = vmatpush1.bf16.msra.mxu0 %v723_v22  ;;  %683 = vpush %v733_v30 }
  0x61   :  { %672 = vmatpush3.bf16.msra.mxu1 %v722_v21  ;;  %284 = vmatprep.subr.bf16.mxu0 %v724_v23 }
  0x62   :  { %673 = vmatprep.subr.bf16.mxu1 %v726_v24 }
  0x64   :  { %285 = vmatpush1.bf16.msra.mxu0 %v727_v25 }
  0x65   :  { %674 = vmatpush3.bf16.msra.mxu1 %v726_v24 }
  0x67   :  { %303 = vmatmul.mubr.bf16.vlgmr.msra.gmra.mrb[0].mxu0 %v728_v19  ;;  %v500_v19 = vlaneseq }
  0x68   :  { %676 = vmatmul.mubr.bf16.vlgmr.msra.gmra.mrb[0].mxu1 %v729_v26  ;;  %312 = vmatprep.mubr.bf16.mxu0 %v836_v2 }
  0x69   :  { %679 = vmatprep.mubr.bf16.mxu1 %v730_v27 }
  0x6f   :  { %313 = vmatmul.mubr.bf16.gmra.mrb[4].mxu0 %v729_v26 }
  0x70   :  { %680 = vmatmul.mubr.bf16.gmra.mrb[4].mxu1 %v731_v28  ;;  %322 = vmatprep.mubr.bf16.mxu0 %v836_v2 }
  0x77   :  { %323 = vmatmul.mubr.bf16.gmra.mrb[8].mxu0 %v730_v27 }
  0x78   :  { %332 = vmatprep.mubr.bf16.mxu0 %v836_v2 }
  0x7f   :  { %333 = vmatmul.mubr.bf16.gmra.mrb[12].mxu0 %v731_v28  ;;  %v927_v28 = vshrl.u32 %v500_v19, 7 }
  0x91   :  { %s684_s23 = spop %683 }
 0x13a   :  { %v304_v32 = vpop.f32.mrb[0].mxu0 }
 0x13b   :  { %v677_v35 = vpop.f32.mrb[0].mxu1  ;;  %v306_v37 = vpop.f32.mrb[1].mxu0  ;;  %v420_v45 = vadd.f32 %v915_v33, %v304_v32 }
 0x13c   :  { %v377_v39 = vpop.f32.mrb[1].mxu1  ;;  %v308_v42 = vpop.f32.mrb[2].mxu0  ;;  %v421_v50 = vadd.f32 %v917_v34, %v306_v37  ;;  %v428_v51 = vadd.f32 %v677_v35, %v416_v38 }
 0x13d   :  { %v422_v43 = vadd.f32 %v410_v31, %v377_v39  ;;  %v678_v44 = vpop.f32.mrb[2].mxu1  ;;  %v423_v46 = vadd.f32 %v919_v36, %v308_v42  ;;  %v310_v47 = vpop.f32.mrb[3].mxu0 }
 0x13e   :  { %v380_v49 = vpop.f32.mrb[3].mxu1  ;;  %v424_v52 = vadd.f32 %v921_v40, %v310_v47  ;;  %v431_v56 = vadd.f32 %v678_v44, %v419_v48 }
 0x13f   :  { %v425_v53 = vadd.f32 %v413_v41, %v380_v49  ;;  %v444_v54 = vmax.f32 %v420_v45, %v423_v46  ;;  %v510_v46 = vsub.s32 2, %v927_v28 }
 0x140   :  { %v453_v55 = vmax.f32 %v421_v50, %v424_v52 }
 0x141   :  { %v462_v57 = vmax.f32 %v422_v43, %v425_v53 }
 0x142   :  { %v314_v61 = vpop.f32.mrb[4].mxu0 }
 0x143   :  { %v463_v60 = vmax.f32 %v462_v57, %v428_v51  ;;  %v681_v62 = vpop.f32.mrb[4].mxu1  ;;  %v426_v0 = vadd.f32 %v414_v58, %v314_v61  ;;  %v316_v1 = vpop.f32.mrb[5].mxu0 }
 0x144   :  { %v393_v2 = vpop.f32.mrb[5].mxu1  ;;  %v427_v5 = vadd.f32 %v415_v59, %v316_v1  ;;  %v318_v7 = vpop.f32.mrb[6].mxu0  ;;  %v440_v10 = vadd.f32 %v681_v62, %v416_v38 }
 0x145   :  { %v464_v4 = vmax.f32 %v463_v60, %v431_v56  ;;  %v434_v6 = vadd.f32 %v410_v31, %v393_v2  ;;  %v682_v8 = vpop.f32.mrb[6].mxu1  ;;  %v445_v9 = vmax.f32 %v444_v54, %v426_v0  ;;  %v429_v11 = vadd.f32 %v417_v63, %v318_v7  ;;  %v320_v12 = vpop.f32.mrb[7].mxu0 }
 0x146   :  { %v396_v13 = vpop.f32.mrb[7].mxu1  ;;  %v454_v15 = vmax.f32 %v453_v55, %v427_v5  ;;  %v430_v16 = vadd.f32 %v418_v3, %v320_v12  ;;  %v443_v21 = vadd.f32 %v682_v8, %v419_v48  ;;  %v498_v48 = vld [vmem:[%s951_s3] sm:$0x7] }
 0x147   :  { %v465_v14 = vrot.slane %v464_v4, 4  ;;  %v437_v17 = vadd.f32 %v413_v41, %v396_v13  ;;  %v446_v18 = vmax.f32 %v445_v9, %v429_v11 }
 0x148   :  { %v455_v22 = vmax.f32 %v454_v15, %v430_v16 }
 0x149   :  { %v466_v20 = vmax.f32 %v464_v4, %v465_v14  ;;  %v489_v23 = vmax.f32 %v434_v6, %v437_v17  ;;  %v447_v27 = vrot.slane %v446_v18, 4  ;;  %v506_v14 = vsub.s32 1, %v927_v28 }
 0x14a   :  { %v324_v26 = vpop.f32.mrb[8].mxu0  ;;  %v456_v31 = vrot.slane %v455_v22, 4 }
 0x14b   :  { %v467_v24 = vrot.slane %v466_v20, 2  ;;  %v490_v25 = vmax.f32 %v489_v23, %v440_v10  ;;  %v326_v29 = vpop.f32.mrb[9].mxu0  ;;  %v432_v37 = vadd.f32 %v915_v33, %v324_v26  ;;  %v448_v44 = vmax.f32 %v446_v18, %v447_v27 }
 0x14c   :  { %v328_v35 = vpop.f32.mrb[10].mxu0  ;;  %v433_v42 = vadd.f32 %v917_v34, %v326_v29  ;;  %v457_v49 = vmax.f32 %v455_v22, %v456_v31  ;;  %v511_v34 = vrot.slane %v498_v48, %v510_v46 }
 0x14d   :  { %v468_v30 = vmax.f32 %v466_v20, %v467_v24  ;;  %v491_v32 = vmax.f32 %v490_v25, %v443_v21  ;;  %v435_v38 = vadd.f32 %v919_v36, %v328_v35  ;;  %v330_v39 = vpop.f32.mrb[11].mxu0  ;;  %v449_v52 = vrot.slane %v448_v44, 2 }
 0x14e   :  { %v436_v43 = vadd.f32 %v921_v40, %v330_v39  ;;  %v458_v55 = vrot.slane %v457_v49, 2  ;;  %v507_v25 = vrot.slane %v498_v48, %v506_v14 }
 0x14f   :  { %v492_v41 = vrot.slane %v491_v32, 4  ;;  %v471_v45 = vmax.f32 %v432_v37, %v435_v38  ;;  %v469_v47 = vrot.slane %v468_v30, 1  ;;  %v450_v5 = vmax.f32 %v448_v44, %v449_v52 }
 0x150   :  { %v480_v33 = vmax.f32 %v433_v42, %v436_v43  ;;  %v459_v7 = vmax.f32 %v457_v49, %v458_v55 }
 0x151   :  { %v493_v50 = vmax.f32 %v491_v32, %v492_v41  ;;  %v470_v60 = vmax.f32 %v468_v30, %v469_v47 }
 0x152   :  { %v334_v36 = vpop.f32.mrb[12].mxu0  ;;  %v460_v16 = vrot.slane %v459_v7, 1 }
 0x153   :  { %v494_v51 = vrot.slane %v493_v50, 2  ;;  %v438_v53 = vadd.f32 %v414_v58, %v334_v36  ;;  %v336_v54 = vpop.f32.mrb[13].mxu0  ;;  %v517_v10 = vadd.f32 %v511_v34, %v470_v60  ;;  %v527_v58 = vld [vmem:[%s952_s4] sm:$0x7]  ;;  %s574_s4 = sld [smem:[#allocation8]] }
 0x154   :  { %v439_v56 = vadd.f32 %v415_v59, %v336_v54  ;;  %v338_v57 = vpop.f32.mrb[14].mxu0  ;;  %v502_v59 = vsub.s32 0, %v927_v28  ;;  %v461_v27 = vmax.f32 %v459_v7, %v460_v16  ;;  %v536_v49 = vrot.slane %v527_v58, %v506_v14 }
 0x155   :  { %v495_v40 = vmax.f32 %v493_v50, %v494_v51  ;;  %v472_v61 = vmax.f32 %v471_v45, %v438_v53  ;;  %v441_v62 = vadd.f32 %v417_v63, %v338_v57  ;;  %v340_v0 = vpop.f32.mrb[15].mxu0  ;;  %v451_v63 = vrot.slane %v450_v5, 1 }
 0x156   :  { %v481_v2 = vmax.f32 %v480_v33, %v439_v56  ;;  %v442_v4 = vadd.f32 %v418_v3, %v340_v0  ;;  %v540_v3 = vrot.slane %v527_v58, %v510_v46  ;;  %v523_v18 = vmax.f32 %v517_v10, 0.0 }
 0x157   :  { %v496_v1 = vrot.slane %v495_v40, 1  ;;  %v473_v6 = vmax.f32 %v472_v61, %v441_v62  ;;  %v503_v21 = vrot.slane %v498_v48, %v502_v59  ;;  %v452_v24 = vmax.f32 %v450_v5, %v451_v63 }
 0x158   :  { %v482_v8 = vmax.f32 %v481_v2, %v442_v4  ;;  %v546_v30 = vmul.f32 %v540_v3, %v523_v18  ;;  %v516_v39 = vadd.f32 %v507_v25, %v461_v27  ;;  %v532_v46 = vrot.slane %v527_v58, %v502_v59 }
 0x159   :  { %v497_v9 = vmax.f32 %v495_v40, %v496_v1  ;;  %v474_v11 = vrot.slane %v473_v6, 4  ;;  %v515_v37 = vadd.f32 %v503_v21, %v452_v24  ;;  %v579_v61 = vstv %s574_s4 }
 0x15a   :  { %v483_v12 = vrot.slane %v482_v8, 4  ;;  %v522_v47 = vmax.f32 %v516_v39, 0.0  ;;  %v581_v0 = vstv %s645_s1  ;;  %v587_v2 = vstv %s684_s23 }
 0x15b   :  { %v520_v13 = vadd.f32 %v511_v34, %v497_v9  ;;  %v475_v15 = vmax.f32 %v473_v6, %v474_v11  ;;  %v521_v44 = vmax.f32 %v515_v37, 0.0  ;;  %v589_v5 = vstv %s643_s21 }
 0x15c   :  { %v484_v17 = vmax.f32 %v482_v8, %v483_v12  ;;  %v545_v52 = vmul.f32 %v536_v49, %v522_v47  ;;  %v591_v7 = vstv %s644_s22 }
 0x15d   :  { %v526_v19 = vmax.f32 %v520_v13, 0.0  ;;  %v476_v20 = vrot.slane %v475_v15, 2  ;;  %v544_v51 = vmul.f32 %v532_v46, %v521_v44 }
 0x15e   :  { %v485_v22 = vrot.slane %v484_v17, 2 }
 0x15f   :  { %v549_v23 = vmul.f32 %v540_v3, %v526_v19  ;;  %v477_v26 = vmax.f32 %v475_v15, %v476_v20 }
 0x160   :  { %v486_v29 = vmax.f32 %v484_v17, %v485_v22 }
 0x161   :  { %v561_v31 = vrot.slane %v549_v23, 7  ;;  %v478_v32 = vrot.slane %v477_v26, 1 }
 0x162   :  { %v487_v28 = vrot.slane %v486_v29, 1 }
 0x163   :  { %v562_v35 = vsel %vm557_vm0, %v561_v31, %v546_v30  ;;  %v479_v38 = vmax.f32 %v477_v26, %v478_v32 }
 0x164   :  { %v488_v41 = vmax.f32 %v486_v29, %v487_v28  ;;  %v570_v57 = vsel %vm566_vm1, %v562_v35, 0.0 }
 0x165   :  { %v518_v42 = vadd.f32 %v503_v21, %v479_v38 }
 0x166   :  { %v519_v43 = vadd.f32 %v507_v25, %v488_v41 }
 0x167   :  { %v524_v45 = vmax.f32 %v518_v42, 0.0 }
 0x168   :  { %v525_v48 = vmax.f32 %v519_v43, 0.0 }
 0x169   :  { %v547_v50 = vmul.f32 %v532_v46, %v524_v45 }
 0x16a   :  { %v548_v33 = vmul.f32 %v536_v49, %v525_v48 }
 0x16b   :  { %v556_v36 = vrot.slane %v547_v50, 7 }
 0x16c   :  { %v559_v53 = vrot.slane %v548_v33, 7 }
 0x16d   :  { %v558_v54 = vsel %vm557_vm0, %v556_v36, %v544_v51 }
 0x16e   :  { %v560_v34 = vsel %vm557_vm0, %v559_v53, %v545_v52  ;;  %v567_v55 = vsel %vm566_vm1, %v558_v54, 0.0 }
 0x16f   :  { %v568_v40 = vsel %vm566_vm1, %v560_v34, 0.0 }
 0x170   :  { %v569_v56 = vadd.f32 %v568_v40, %v567_v55 }
 0x172   :  { %v571_v60 = vadd.f32 %v570_v57, %v569_v56 }
 0x174   :  { %572 = vadd.xlane.f32.xlu0 %v571_v60 }
 0x201   :  { %v573_v62 = vpop.xlane.xlu0 %572 }
 0x202   :  { %v580_v1 = vadd.f32 %v579_v61, %v573_v62 }
 0x204   :  { %v582_v4 = vsub.f32 %v580_v1, %v581_v0 }
 0x206   :  { %v588_v6 = vmul.f32 %v587_v2, %v582_v4 }
 0x208   :  { %v590_v8 = vmul.f32 %v589_v5, %v588_v6 }
 0x20a   :  { %v592_v9 = vadd.f32 %v591_v7, %v590_v8 }
 0x20c   :  { %v594_v10 = vsub.f32 0.0, %v592_v9  ;;  %v600_v58 = vmul.f32 1.442695, %v592_v9  ;;  %vm593_vm3 = vcmp.ge.f32.partialorder %v592_v9, 0.0 }
 0x20e   :  { %v595_v11 = vmul.f32 1.442695, %v594_v10  ;;  %734 = vpow2.f32 %v600_v58 }
 0x210   :  { %736 = vpow2.f32 %v595_v11 }
 0x218   :  { %v735_v59 = vpop.eup %734 }
 0x219   :  { %v602_v12 = vadd.f32 1.0, %v735_v59 }
 0x21a   :  { %v737_v13 = vpop.eup %736 }
 0x21b   :  { %v597_v63 = vadd.f32 1.0, %v737_v13  ;;  %738 = vrcp.f32 %v602_v12 }
 0x21d   :  { %740 = vrcp.f32 %v597_v63 }
 0x225   :  { %v739_v14 = vpop.eup %738 }
 0x226   :  { %v604_v15 = vmul.f32 %v739_v14, %v735_v59 }
 0x227   :  { %v741_v3 = vpop.eup %740 }
 0x228   :  { %v605_v16 = vsel %vm593_vm3, %v741_v3, %v604_v15 }
 0x229   :  { %607 = vst.msk [vmem:[%s954_s6] sm:$0x3] %vm606_vm2, %v605_v16 }
 0x22a   :  { %612 = vsyncpa [#allocation3], 1 }
 0x22b   :  { %613 = vsyncpa [#allocation6], 1 }
 0x22c   :  { %614 = vsyncpa [#allocation4], 1 }

</bundles_post_ra>
